<compile_context>
chip_gen: v7x
topology: tpu7x:2x2x1
jax: 0.10.0
libtpu: 0.0.40
codegen_flags: <defaults>
</compile_context>

<pallas_src>
import functools

import jax
import jax.numpy as jnp
from jax.experimental import pallas as pl
from jax.experimental.pallas import tpu as pltpu


def _lane_block_sum(x, tile_p):
    """(C, tile_p) -> (C, 128) by summing 128-wide lane blocks.

    Static, 128-aligned slices of a value are vreg selections (no data
    movement); the adds are pure VPU, so the running partial stays in a
    handful of vregs instead of a full-tile VMEM accumulator.
    """
    n_blk = tile_p // 128
    out = x[:, 0:128]
    for b in range(1, n_blk):
        out = out + x[:, b * 128:(b + 1) * 128]
    return out


# --------------- single-block kernels (grid=(1,), no scratch) ---------------

def _masked_single_kernel(w_ref, cid_ref, out_ref):
    w_abs = jnp.abs(w_ref[...].astype(jnp.float32))              # (C, P)
    cls = jax.lax.broadcasted_iota(jnp.int32, w_abs.shape, 0)    # row = class
    masked = jnp.where(cid_ref[...] == cls, 0.0, w_abs)          # 1 - id^T
    out_ref[...] = jnp.sum(masked)[None, None]


def _plain_single_kernel(w_ref, out_ref):
    out_ref[...] = jnp.sum(jnp.abs(w_ref[...].astype(jnp.float32)))[None, None]


# --------------- tiled kernels (grid=(P tiles,), (C,128) scratch) -----------

def _masked_tiled_kernel(w_ref, cid_ref, out_ref, acc_ref, *, tile_p, p_total):
    k = pl.program_id(0)

    @pl.when(k == 0)
    def _():
        acc_ref[...] = jnp.zeros_like(acc_ref)

    w_abs = jnp.abs(w_ref[...].astype(jnp.float32))              # (C, tile_p)
    cls = jax.lax.broadcasted_iota(jnp.int32, w_abs.shape, 0)
    masked = jnp.where(cid_ref[...] == cls, 0.0, w_abs)

    if p_total % tile_p != 0:                                    # ragged tail
        lane = jax.lax.broadcasted_iota(jnp.int32, w_abs.shape, 1)
        masked = jnp.where(k * tile_p + lane < p_total, masked, 0.0)

    acc_ref[...] += _lane_block_sum(masked, tile_p)              # (C, 128)

    @pl.when(k == pl.num_programs(0) - 1)
    def _():
        out_ref[...] = jnp.sum(acc_ref[...])[None, None]


def _plain_tiled_kernel(w_ref, out_ref, acc_ref, *, tile_p, p_total):
    k = pl.program_id(0)

    @pl.when(k == 0)
    def _():
        acc_ref[...] = jnp.zeros_like(acc_ref)

    w_abs = jnp.abs(w_ref[...].astype(jnp.float32))

    if p_total % tile_p != 0:
        lane = jax.lax.broadcasted_iota(jnp.int32, w_abs.shape, 1)
        w_abs = jnp.where(k * tile_p + lane < p_total, w_abs, 0.0)

    acc_ref[...] += _lane_block_sum(w_abs, tile_p)

    @pl.when(k == pl.num_programs(0) - 1)
    def _():
        out_ref[...] = jnp.sum(acc_ref[...])[None, None]


def l1_readout_loss(weight, prototype_class_identity=None, *,
                    class_specific=True, max_tile_p=8192,
                    tile_bytes=4 << 20, single_block_bytes=1 << 20):
    """Pallas implementation of L1ReadoutLoss.forward.

    weight: (C, P) last_layer.weight, any float dtype.
    prototype_class_identity: (P, C) strictly one-hot per prototype (required
      when class_specific=True; the mask 1 - identity^T is rebuilt in-kernel
      from argmax).  For GroupedLinear, call with class_specific=False.
    """
    weight = jnp.asarray(weight)
    C, P = weight.shape
    itemsize = jnp.dtype(weight.dtype).itemsize

    use_mask = bool(class_specific)
    if use_mask:
        if prototype_class_identity is None:
            raise ValueError("class_specific=True needs prototype_class_identity")
        # Tiny (1, P) prototype->class vector: the only extra bytes streamed.
        proto_class = jnp.argmax(
            jnp.asarray(prototype_class_identity), axis=1
        ).astype(jnp.int32).reshape(1, P)

    out_shape = jax.ShapeDtypeStruct((1, 1), jnp.float32)
    cparams = pltpu.CompilerParams(dimension_semantics=("arbitrary",))

    # ---- single-block fast path (typical readout layer) --------------------
    if C * P * itemsize <= single_block_bytes:
        if use_mask:
            out = pl.pallas_call(
                _masked_single_kernel,
                out_shape=out_shape,
                grid=(1,),
                in_specs=[pl.BlockSpec((C, P), lambda k: (0, 0)),
                          pl.BlockSpec((1, P), lambda k: (0, 0))],
                out_specs=pl.BlockSpec((1, 1), lambda k: (0, 0)),
                compiler_params=cparams,
            )(weight, proto_class)
        else:
            out = pl.pallas_call(
                _plain_single_kernel,
                out_shape=out_shape,
                grid=(1,),
                in_specs=[pl.BlockSpec((C, P), lambda k: (0, 0))],
                out_specs=pl.BlockSpec((1, 1), lambda k: (0, 0)),
                compiler_params=cparams,
            )(weight)
        return out[0, 0]

    # ---- tiled, pipelined path ---------------------------------------------
    # Large lane-aligned P tiles; ragged tail masked in-kernel (no jnp.pad of
    # W in the wrapper).  Tile cap ~tile_bytes of streamed weight; with the
    # (C,128) scratch this stays far under VMEM limits on v5e/v6e/v7x.
    cap = max(128, (tile_bytes // (C * itemsize)) // 128 * 128)
    tile_p = int(min(max_tile_p, cap, pl.cdiv(P, 128) * 128))
    grid = (pl.cdiv(P, tile_p),)
    scratch_shapes = [pltpu.VMEM((C, 128), jnp.float32)]
    # TODO(synk): on v5e, sweeping pipeline_mode=pl.Buffered(3) on the weight
    # BlockSpec (and, on v7x for multi-MiB W, a 2-way "parallel" P split
    # across the two TensorCores) could shave a few % more; omitted here.

    if use_mask:
        kern = functools.partial(_masked_tiled_kernel, tile_p=tile_p, p_total=P)
        out = pl.pallas_call(
            kern,
            out_shape=out_shape,
            grid=grid,
            in_specs=[pl.BlockSpec((C, tile_p), lambda k: (0, k)),
                      pl.BlockSpec((1, tile_p), lambda k: (0, k))],
            out_specs=pl.BlockSpec((1, 1), lambda k: (0, 0)),
            scratch_shapes=scratch_shapes,
            compiler_params=cparams,
        )(weight, proto_class)
    else:
        kern = functools.partial(_plain_tiled_kernel, tile_p=tile_p, p_total=P)
        out = pl.pallas_call(
            kern,
            out_shape=out_shape,
            grid=grid,
            in_specs=[pl.BlockSpec((C, tile_p), lambda k: (0, k))],
            out_specs=pl.BlockSpec((1, 1), lambda k: (0, 0)),
            scratch_shapes=scratch_shapes,
            compiler_params=cparams,
        )(weight)
    return out[0, 0]


def _make_inputs(key, num_classes, proto_classes):
    identity = jax.nn.one_hot(proto_classes, num_classes, dtype=jnp.float32)  # (P,C)
    identity_t = identity.T                                                   # (C,P)
    base = 1.0 * identity_t + (-0.5) * (1.0 - identity_t)
    weight = base + 0.01 * jax.random.normal(key, base.shape, dtype=jnp.float32)
    return weight, identity


if __name__ == "__main__":
    key = jax.random.PRNGKey(0)
    num_classes = 8

    # ---- test 1: single-block fast path (class_specific True / False) -----
    proto_classes = jnp.arange(num_classes * 32) // 32            # P = 256
    weight, identity = _make_inputs(key, num_classes, proto_classes)

    loss = jax.block_until_ready(
        l1_readout_loss(weight, identity, class_specific=True))
    ref = jnp.sum(jnp.abs(weight * (1.0 - identity.T)))
    assert jnp.allclose(loss, ref, rtol=2e-5, atol=1e-3), (loss, ref)

    loss_ns = jax.block_until_ready(
        l1_readout_loss(weight, identity, class_specific=False))
    ref_ns = jnp.sum(jnp.abs(weight))
    assert jnp.allclose(loss_ns, ref_ns, rtol=2e-5, atol=1e-3), (loss_ns, ref_ns)

    # ---- test 2: tiled + ragged tail, masked kernel (P=200, tile_p=128) ---
    proto_classes2 = jnp.arange(num_classes * 25) // 25            # P = 200
    weight2, identity2 = _make_inputs(jax.random.PRNGKey(0), num_classes,
                                      proto_classes2)
    loss2 = jax.block_until_ready(
        l1_readout_loss(weight2, identity2, class_specific=True,
                        max_tile_p=128, single_block_bytes=0))
    ref2 = jnp.sum(jnp.abs(weight2 * (1.0 - identity2.T)))
    assert jnp.allclose(loss2, ref2, rtol=2e-5, atol=1e-3), (loss2, ref2)

    # ---- test 3: tiled + ragged, multi lane-block tiles (P=520, tile_p=256)
    proto_classes3 = jnp.arange(520) % num_classes                 # P = 520
    weight3, identity3 = _make_inputs(jax.random.PRNGKey(0), num_classes,
                                      proto_classes3)
    loss3 = jax.block_until_ready(
        l1_readout_loss(weight3, identity3, class_specific=True,
                        max_tile_p=256, single_block_bytes=0))
    ref3 = jnp.sum(jnp.abs(weight3 * (1.0 - identity3.T)))
    assert jnp.allclose(loss3, ref3, rtol=2e-5, atol=1e-3), (loss3, ref3)

    # ---- test 4: tiled plain-L1 path (GroupedLinear / class_specific=False)
    loss4 = jax.block_until_ready(
        l1_readout_loss(weight, identity, class_specific=False,
                        max_tile_p=128, single_block_bytes=0))
    assert jnp.allclose(loss4, ref_ns, rtol=2e-5, atol=1e-3), (loss4, ref_ns)

    print("KERNEL_OK")
</pallas_src>

<mosaic_0001>
module attributes {stable_mosaic.version = 11 : i64} {
  func.func @_masked_single_kernel(%arg0: i32, %arg1: memref<8x256xf32, #tpu.memory_space<vmem>>, %arg2: memref<1x256xi32, #tpu.memory_space<vmem>>, %arg3: memref<1x1xf32, #tpu.memory_space<vmem>>) attributes {dimension_semantics = [#tpu.dimension_semantics<arbitrary>], iteration_bounds = array<i64: 1>, scalar_prefetch = 0 : i64, scratch_operands = 0 : i64, tpu.core_type = #tpu.core_type<tc>, window_params = [{pipeline_mode = #tpu.pipeline_mode<synchronous>, transform_indices = @transform_0, window_bounds = array<i64: 8, 256>}, {pipeline_mode = #tpu.pipeline_mode<synchronous>, transform_indices = @transform_1, window_bounds = array<i64: 1, 256>}, {pipeline_mode = #tpu.pipeline_mode<synchronous>, transform_indices = @transform_2, window_bounds = array<i64: 1, 1>}]} {
    %c0 = arith.constant 0 : index
    %c0_0 = arith.constant 0 : index
    %0 = vector.load %arg1[%c0, %c0_0] : memref<8x256xf32, #tpu.memory_space<vmem>>, vector<8x256xf32>
    %1 = math.absf %0 : vector<8x256xf32>
    %2 = tpu.iota {dimensions = array<i32: 0>} : vector<8x256xi32>
    %c0_1 = arith.constant 0 : index
    %c0_2 = arith.constant 0 : index
    %3 = vector.load %arg2[%c0_1, %c0_2] : memref<1x256xi32, #tpu.memory_space<vmem>>, vector<1x256xi32>
    %4 = vector.broadcast %3 : vector<1x256xi32> to vector<8x256xi32>
    %5 = arith.cmpi eq, %4, %2 : vector<8x256xi32>
    %cst = arith.constant 0.000000e+00 : f32
    %6 = vector.broadcast %cst : f32 to vector<8x256xf32>
    %7 = arith.select %5, %6, %1 : vector<8x256xi1>, vector<8x256xf32>
    %8 = vector.shape_cast %7 : vector<8x256xf32> to vector<1x8x256xf32>
    %cst_3 = arith.constant dense<0.000000e+00> : vector<1xf32>
    %9 = vector.multi_reduction <add>, %8, %cst_3 [1, 2] : vector<1x8x256xf32> to vector<1xf32>
    %10 = vector.shape_cast %9 : vector<1xf32> to vector<1x1x1xf32>
    %11 = vector.extract %10[0, 0, 0] : f32 from vector<1x1x1xf32>
    %12 = vector.broadcast %11 : f32 to vector<1x1xf32>
    %c0_4 = arith.constant 0 : index
    %c0_5 = arith.constant 0 : index
    %13 = vector.load %arg3[%c0_4, %c0_5] : memref<1x1xf32, #tpu.memory_space<vmem>>, vector<1x1xf32>
    tpu.vector_store %arg3[%c0_4, %c0_5], %12 {strides = array<i32>} : memref<1x1xf32, #tpu.memory_space<vmem>>, vector<1x1xf32>,
    return
  }
  func.func @transform_0(%arg0: i32) -> (i32, i32) {
    %c0_i32 = arith.constant 0 : i32
    %c0_i32_0 = arith.constant 0 : i32
    %c0_i32_1 = arith.constant 0 : i32
    return %c0_i32, %c0_i32_0 : i32, i32
  }
  func.func @transform_1(%arg0: i32) -> (i32, i32) {
    %c0_i32 = arith.constant 0 : i32
    %c0_i32_0 = arith.constant 0 : i32
    %c0_i32_1 = arith.constant 0 : i32
    return %c0_i32, %c0_i32_0 : i32, i32
  }
  func.func @transform_2(%arg0: i32) -> (i32, i32) {
    %c0_i32 = arith.constant 0 : i32
    %c0_i32_0 = arith.constant 0 : i32
    %c0_i32_1 = arith.constant 0 : i32
    return %c0_i32, %c0_i32_0 : i32, i32
  }
}

</mosaic_0001>

<bundles_post_ra>
// kernel: tpu_custom_call.1
= control target key start
LH: loop header
LB: loop body
LE: loop exit
PB: predicated region body
PF: predicated region fallthrough
CT: control target
= control target key end

     0   :  { %7 = vsyncpa [#allocation3], 0  ;;  %s167_s0 = inlined_call_operand.hbm [shape: f32[8,256], index: 0, kind: input, shape index: {}]   ;;  %s168_s1 = inlined_call_operand.vmem [shape: s32[1,256], index: 1, kind: input, shape index: {}]   ;;  %s169_s2 = inlined_call_operand.hbm [shape: f32[1,1], index: 2, kind: output, shape index: {}]  }
   0x1   :  { %8 = vsyncpa [#allocation4], 0  ;;  %s123_s9 = smov [#allocation2]   ;;  %s75_s13 = scalar_lea.hbm %s167_s0, 256 }
   0x2   :  { %s15_s10 = sshll.u32 %s123_s9, 4  ;;  %p76_p0 = scmp.ne.s32.totalorder %s167_s0, %s75_s13  ;;  %s16_s10 = int_to_ptr.vmem [resolvable:$true] %s15_s10 }
   0x3   :  { %p79_p1 = scmp.lt.u32.totalorder %s75_s13, %s167_s0 }
   0x5   :  { %p81_p2 = pnand %p79_p1, %p76_p0 }
   0x7   :  { %84 = shalt.err (!%p81_p2)
}
   0x8   :  { %s85_s18 = scalar_lea.vmem %s16_s10, 256  ;;  %p90_p4 = scmp.lt.s32.totalorder %s16_s10, %s16_s10 }
   0x9   :  { %p86_p3 = scmp.ne.s32.totalorder %s16_s10, %s85_s18  ;;  %p91_p5 = scmp.lt.s32.totalorder %s85_s18, %s85_s18 }
   0xb   :  { %p92_p6 = por %p91_p5, %p90_p4 }
   0xd   :  { %p93_p7 = pnand %p92_p6, %p86_p3 }
   0xf   :  { %96 = shalt.err (!%p93_p7)
}
  0x10   :  { %18 = dma.hbm_to_vmem [thread:$0]  %s167_s0, 256, %s16_s10, [#allocation3]  }
  0x11   :  { %119 = dma.done.wait [#allocation3], 256  }
  0x12   :  { %120 = vsyncadd [#allocation3], 4294967040  ;;  %v28_v0 = vlaneseq  ;;  %v24_v4 = vld [vmem:[#allocation2] sm:$0xff]  ;;  %v25_v5 = vld [vmem:[#allocation2 + $0x8] sm:$0xff]  ;;  %s124_s0 = smov [#allocation5]   ;;  %vm54_vm2 = vcmask 0  }
  0x13   :  { %v30_v6 = vld [vmem:[%s168_s1] sm:$0x3]  ;;  %v26_v7 = vand.u32 2147483647, %v24_v4  ;;  %v27_v8 = vand.u32 2147483647, %v25_v5 }
  0x14   :  { %v29_v1 = vshrl.u32 %v28_v0, 7  ;;  %s62_s1 = sshll.u32 %s124_s0, 4  ;;  %s63_s1 = int_to_ptr.vmem [resolvable:$true] %s62_s1 }
  0x15   :  { %s97_s24 = scalar_lea.vmem %s63_s1, 16  ;;  %s101_s25 = scalar_lea.vmem %s63_s1, 32 }
  0x16   :  { %v33_v2 = vsub.s32 0, %v29_v1  ;;  %v37_v3 = vsub.s32 1, %v29_v1  ;;  %p98_p8 = scmp.ne.s32.totalorder %s63_s1, %s97_s24  ;;  %p102_p9 = scmp.lt.s32.totalorder %s63_s1, %s63_s1 }
  0x17   :  { %p103_p10 = scmp.lt.s32.totalorder %s101_s25, %s97_s24 }
  0x18   :  { %v34_v9 = vrot.slane %v30_v6, %v33_v2  ;;  %v38_v10 = vrot.slane %v30_v6, %v37_v3 }
  0x19   :  { %p104_p11 = por %p103_p10, %p102_p9 }
  0x1a   :  { %vm39_vm0 = vcmp.eq.s32.totalorder %v34_v9, %v29_v1  ;;  %vm40_vm1 = vcmp.eq.s32.totalorder %v38_v10, %v29_v1 }
  0x1b   :  { %v41_v11 = vsel %vm39_vm0, 0.0, %v26_v7  ;;  %v42_v12 = vsel %vm40_vm1, 0.0, %v27_v8  ;;  %p105_p12 = pnand %p104_p11, %p98_p8 }
  0x1c   :  { %v43_v13 = vadd.f32 %v42_v12, %v41_v11 }
  0x1e   :  { %44 = vadd.xlane.f32.xlu0 %v43_v13 }
  0xab   :  { %v45_v14 = vpop.xlane.xlu0 %44 }
  0xac   :  { %v46_v15 = vrot.slane %v45_v14, 4 }
  0xae   :  { %v47_v16 = vadd.f32 %v46_v15, %v45_v14 }
  0xb0   :  { %v48_v17 = vrot.slane %v47_v16, 2 }
  0xb2   :  { %v49_v18 = vadd.f32 %v48_v17, %v47_v16 }
  0xb4   :  { %v50_v19 = vrot.slane %v49_v18, 1 }
  0xb6   :  { %v51_v20 = vadd.f32 %v50_v19, %v49_v18 }
  0xb8   :  { %71 = vpush %v51_v20 }
  0xe9   :  { %s72_s23 = spop %71 }
  0xea   :  { %v53_v21 = vstv %s72_s23 }
  0xeb   :  { %55 = vst.msk [vmem:[#allocation5] sm:$0x1] %vm54_vm2, %v53_v21 }
  0xec   :  { %108 = shalt.err (!%p105_p12)
}
  0xed   :  { %s109_s28 = scalar_lea.hbm %s169_s2, 16 }
  0xee   :  { %p110_p13 = scmp.ne.s32.totalorder %s169_s2, %s109_s28  ;;  %p113_p0 = scmp.lt.u32.totalorder %s109_s28, %s169_s2 }
  0xf0   :  { %p115_p1 = pnand %p113_p0, %p110_p13 }
  0xf2   :  { %118 = shalt.err (!%p115_p1)
}
  0xf3   :  { %65 = dma.vmem_to_hbm [thread:$0]  %s63_s1, 16, %s169_s2, [#allocation4]  }
  0xf4   :  { %121 = dma.done.wait [#allocation4], 16  }
  0xf5   :  { %122 = vsyncadd [#allocation4], 4294967280 }
  0xf6   :  { %69 = vsyncpa [#allocation3], 1 }
  0xf7   :  { %70 = vsyncpa [#allocation4], 1 }

</bundles_post_ra>
